<compile_context>
chip_gen: v5e
topology: v5e:2x2
jax: 0.10.0
libtpu: 0.0.40
codegen_flags: <defaults>
</compile_context>

<pallas_src>
import jax
import jax.numpy as jnp
import numpy as np
from jax import lax
from jax.experimental import pallas as pl
from jax.experimental.pallas import tpu as pltpu


# ------------------------------------------------------------------ kernel ---

def _bcnet_fused_kernel(v_ref, q_ref, wv_ref, bv_ref, wq_ref, bq_ref,
                        hmat_ref, hbias_ref, o_ref):
    # Per grid step (Bt batch elements):
    #   v_ref    (Bt, Nv, v_dim)    q_ref     (Bt, Nq, q_dim)
    #   wv_ref   (v_dim, Kp)        bv_ref    (1, Kp)        f32
    #   wq_ref   (q_dim, Kp)        bq_ref    (1, Kp)        f32
    #   hmat_ref (H, Kp)            hbias_ref (H, 1)         f32
    #   o_ref    (Bt, H, Nv*Nq)     f32
    Bt, Nv, Vd = v_ref.shape
    _,  Nq, Qd = q_ref.shape
    H,  Kp = hmat_ref.shape
    NVQ = Nv * Nq
    mxu_dtype = wv_ref.dtype          # f32 or bf16 (set in prepare_bcnet_params)

    # Fold the Bt batch elements into the matmul M dim: one big MXU pass per
    # projection instead of Bt tiny ones.  (Reshape merges leading dims only;
    # the lane dim is unchanged, so it is layout-preserving.)
    v2 = v_ref[...].reshape(Bt * Nv, Vd).astype(mxu_dtype)
    q2 = q_ref[...].reshape(Bt * Nq, Qd).astype(mxu_dtype)

    # FCNet in eval mode: ReLU(x @ W_eff^T + b); dropout is identity.
    # MXU in mxu_dtype, bias/ReLU/accumulate in f32.
    v_all = jnp.maximum(
        jnp.dot(v2, wv_ref[...], preferred_element_type=jnp.float32) + bv_ref[...],
        0.0)                                               # (Bt*Nv, Kp) f32
    q_all = jnp.maximum(
        jnp.dot(q2, wq_ref[...], preferred_element_type=jnp.float32) + bq_ref[...],
        0.0)                                               # (Bt*Nq, Kp) f32

    hm = hmat_ref[...]                                     # (H, Kp), mxu_dtype
    # Hoist the bias broadcast out of the unrolled loop (broadcast_in_dim is not CSE'd).
    hb = jnp.broadcast_to(hbias_ref[...], (H, NVQ))        # (H, Nv*Nq) f32

    # Fully unrolled per-batch bilinear stage (Bt is small & static).
    for b in range(Bt):
        vb = v_all[b * Nv:(b + 1) * Nv, :]                 # (Nv, Kp) f32
        qb = q_all[b * Nq:(b + 1) * Nq, :]                 # (Nq, Kp) f32
        # vq[v*Nq + j, k] = v_[v,k] * q_[j,k]  ->  (Nv*Nq, Kp).  Kp is 128-aligned,
        # so the merge of the two sublane dims is a no-op relayout.
        vq = (vb[:, None, :] * qb[None, :, :]).reshape(NVQ, Kp).astype(mxu_dtype)
        # logits[h, v*Nq+j] = sum_k hm[h,k] * vq[v*Nq+j,k]   (contract on K, no .T)
        out_b = lax.dot_general(hm, vq,
                                dimension_numbers=(((1,), (1,)), ((), ())),
                                preferred_element_type=jnp.float32)   # (H, NVQ)
        o_ref[b] = out_b + hb                              # lane-dense (8, 128) store


# ----------------------------------------------------------------- wrapper ---

def _pick_block_b(B):
    """Largest divisor of B that still leaves >= 2 grid steps (keeps a 'parallel'
    batch axis the v7x megacore can shard; perf-neutral on v5e/v6e)."""
    if B < 2:
        return 1
    for bt in range(B // 2, 0, -1):
        if B % bt == 0:
            return bt
    return 1


def bcnet_forward(prepared, v, q, *, block_b=None):
    """BCNet.forward for the (h_out <= self.c) branch, eval mode.

    `prepared` comes from prepare_bcnet_params(); returns (B, H, Nv, Nq) logits (f32).
    """
    # TODO(synk): dropout (p=0.2 / p=0.5) is identity here (eval mode); training-mode
    #             stochastic dropout is not implemented.
    B, Nv, v_dim = v.shape
    _, Nq, q_dim = q.shape
    wv_t, bv2 = prepared["wv_t"], prepared["bv2"]
    wq_t, bq2 = prepared["wq_t"], prepared["bq2"]
    hm, hb = prepared["h_mat2"], prepared["hbias_col"]
    H, Kp = hm.shape
    NVQ = Nv * Nq

    Bt = _pick_block_b(B) if block_b is None else block_b
    assert B % Bt == 0, (B, Bt)

    slab = pl.pallas_call(
        _bcnet_fused_kernel,
        out_shape=jax.ShapeDtypeStruct((B, H, NVQ), jnp.float32),
        grid=(B // Bt,),
        in_specs=[
            pl.BlockSpec((Bt, Nv, v_dim), lambda g: (g, 0, 0)),
            pl.BlockSpec((Bt, Nq, q_dim), lambda g: (g, 0, 0)),
            pl.BlockSpec((v_dim, Kp), lambda g: (0, 0)),
            pl.BlockSpec((1, Kp), lambda g: (0, 0)),
            pl.BlockSpec((q_dim, Kp), lambda g: (0, 0)),
            pl.BlockSpec((1, Kp), lambda g: (0, 0)),
            pl.BlockSpec((H, Kp), lambda g: (0, 0)),
            pl.BlockSpec((H, 1), lambda g: (0, 0)),
        ],
        out_specs=pl.BlockSpec((Bt, H, NVQ), lambda g: (g, 0, 0)),
        compiler_params=pltpu.CompilerParams(dimension_semantics=("parallel",)),
    )(v, q, wv_t, bv2, wq_t, bq2, hm, hb)

    # Pure reshape, no transpose / extra HBM pass: row-major (B,H,Nv*Nq)==(B,H,Nv,Nq).
    return slab.reshape(B, H, Nv, Nq)


# -------------------------------------------------------------- parameters ---

def init_bcnet_params(key, v_dim, q_dim, h_dim, h_out, k):
    """Deterministic synthetic parameters mirroring BCNet.__init__ shapes."""
    K = h_dim * k
    ks = jax.random.split(key, 8)

    def linear_weightnorm(kw, kb, out_f, in_f):
        # torch nn.Linear-style shapes; weight_norm(dim=None): W_eff = g*V/||V||_F
        v_dir = jax.random.normal(kw, (out_f, in_f), jnp.float32) * 0.05
        bias = jax.random.normal(kb, (out_f,), jnp.float32) * 0.05
        g = jnp.sqrt(jnp.sum(v_dir * v_dir))          # torch init sets g = ||V||
        w_eff = g * v_dir / jnp.sqrt(jnp.sum(v_dir * v_dir))
        return w_eff, bias

    wv, bv = linear_weightnorm(ks[0], ks[1], K, v_dim)   # v_net: Linear(v_dim, K)
    wq, bq = linear_weightnorm(ks[2], ks[3], K, q_dim)   # q_net: Linear(q_dim, K)

    assert h_out is not None and h_out <= 32, "kernel implements the h_out <= c branch"
    h_mat = jax.random.normal(ks[4], (1, h_out, 1, K), jnp.float32)   # .normal_()
    h_bias = jax.random.normal(ks[5], (1, h_out, 1, 1), jnp.float32)  # .normal_()

    return dict(wv=wv, bv=bv, wq=wq, bq=bq, h_mat=h_mat, h_bias=h_bias)


def prepare_bcnet_params(params, compute_dtype=jnp.float32):
    """One-time layout prep (hoisted out of the forward):
      * weights pre-transposed to (in_dim, K),
      * K zero-padded to a multiple of 128 (exact math, lane/MXU aligned),
      * h_mat flattened to (H, Kp), h_bias to a (H, 1) column,
      * MXU operands cast to compute_dtype (use jnp.bfloat16 on v6e/v7x)."""
    wv, bv = params["wv"], params["bv"]            # (K, v_dim), (K,)
    wq, bq = params["wq"], params["bq"]
    h_mat, h_bias = params["h_mat"], params["h_bias"]
    K = wv.shape[0]
    H = h_mat.shape[1]
    Kp = ((K + 127) // 128) * 128
    pad = Kp - K

    def pad_last(x):
        return jnp.pad(x, [(0, 0)] * (x.ndim - 1) + [(0, pad)])

    return dict(
        wv_t=pad_last(jnp.asarray(wv).T).astype(compute_dtype),    # (v_dim, Kp)
        bv2=pad_last(bv.reshape(1, K)).astype(jnp.float32),        # (1, Kp)
        wq_t=pad_last(jnp.asarray(wq).T).astype(compute_dtype),    # (q_dim, Kp)
        bq2=pad_last(bq.reshape(1, K)).astype(jnp.float32),        # (1, Kp)
        h_mat2=pad_last(h_mat.reshape(H, K)).astype(compute_dtype),  # (H, Kp)
        hbias_col=h_bias.reshape(H, 1).astype(jnp.float32),        # (H, 1)
    )


def bcnet_forward_ref(params, v, q):
    """Pure-JAX reference (mirrors the torch forward exactly, full-f32 precision)."""
    hp = lax.Precision.HIGHEST
    v_ = jax.nn.relu(jnp.matmul(v, params["wv"].T, precision=hp) + params["bv"])
    q_ = jax.nn.relu(jnp.matmul(q, params["wq"].T, precision=hp) + params["bq"])
    hm = params["h_mat"].reshape(params["h_mat"].shape[1], -1)   # (H, K)
    hb = params["h_bias"].reshape(-1)                            # (H,)
    logits = jnp.einsum("hk,bvk,bqk->bhvq", hm, v_, q_, precision=hp)
    return logits + hb[None, :, None, None]


# --------------------------------------------------------------------- main --

if __name__ == "__main__":
    # Small shapes consistent with BCNet's forward:
    #   v: (B, Nv, v_dim), q: (B, Nq, q_dim); h_dim=32, k=3 -> K=96 (padded to 128);
    #   h_out=8 (<= c=32); Nv*Nq = 128 -> lane-dense output slab.
    B, Nv, Nq = 8, 16, 8
    v_dim, q_dim, h_dim, h_out, k = 32, 32, 32, 8, 3

    key = jax.random.PRNGKey(0)
    kp, kv, kq = jax.random.split(key, 3)
    params = init_bcnet_params(kp, v_dim, q_dim, h_dim, h_out, k)
    v = jax.random.normal(kv, (B, Nv, v_dim), jnp.float32)
    q = jax.random.normal(kq, (B, Nq, q_dim), jnp.float32)

    ref = jax.block_until_ready(bcnet_forward_ref(params, v, q))

    # f32 MXU path — exact-semantics check.
    prepared_f32 = prepare_bcnet_params(params, compute_dtype=jnp.float32)
    out_f32 = jax.block_until_ready(bcnet_forward(prepared_f32, v, q))
    assert out_f32.shape == (B, h_out, Nv, Nq), out_f32.shape
    np.testing.assert_allclose(np.asarray(out_f32), np.asarray(ref),
                               rtol=1e-4, atol=1e-4)

    # bf16 MXU path (v6e/v7x-friendly; relaxed tolerance for bf16 rounding).
    prepared_bf16 = prepare_bcnet_params(params, compute_dtype=jnp.bfloat16)
    out_bf16 = jax.block_until_ready(bcnet_forward(prepared_bf16, v, q))
    np.testing.assert_allclose(np.asarray(out_bf16), np.asarray(ref),
                               rtol=5e-2, atol=5e-2)

    print("KERNEL_OK")
</pallas_src>

<mosaic_0001>
module attributes {stable_mosaic.version = 11 : i64} {
  func.func @_bcnet_fused_kernel(%arg0: i32, %arg1: memref<4x16x32xf32, #tpu.memory_space<vmem>>, %arg2: memref<4x8x32xf32, #tpu.memory_space<vmem>>, %arg3: memref<32x128xf32, #tpu.memory_space<vmem>>, %arg4: memref<1x128xf32, #tpu.memory_space<vmem>>, %arg5: memref<32x128xf32, #tpu.memory_space<vmem>>, %arg6: memref<1x128xf32, #tpu.memory_space<vmem>>, %arg7: memref<8x128xf32, #tpu.memory_space<vmem>>, %arg8: memref<8x1xf32, #tpu.memory_space<vmem>>, %arg9: memref<4x8x128xf32, #tpu.memory_space<vmem>>) attributes {dimension_semantics = [#tpu.dimension_semantics<parallel>], iteration_bounds = array<i64: 2>, scalar_prefetch = 0 : i64, scratch_operands = 0 : i64, tpu.core_type = #tpu.core_type<tc>, window_params = [{transform_indices = @transform_0, window_bounds = array<i64: 4, 16, 32>}, {transform_indices = @transform_1, window_bounds = array<i64: 4, 8, 32>}, {pipeline_mode = #tpu.pipeline_mode<synchronous>, transform_indices = @transform_2, window_bounds = array<i64: 32, 128>}, {pipeline_mode = #tpu.pipeline_mode<synchronous>, transform_indices = @transform_3, window_bounds = array<i64: 1, 128>}, {pipeline_mode = #tpu.pipeline_mode<synchronous>, transform_indices = @transform_4, window_bounds = array<i64: 32, 128>}, {pipeline_mode = #tpu.pipeline_mode<synchronous>, transform_indices = @transform_5, window_bounds = array<i64: 1, 128>}, {pipeline_mode = #tpu.pipeline_mode<synchronous>, transform_indices = @transform_6, window_bounds = array<i64: 8, 128>}, {pipeline_mode = #tpu.pipeline_mode<synchronous>, transform_indices = @transform_7, window_bounds = array<i64: 8, 1>}, {transform_indices = @transform_8, window_bounds = array<i64: 4, 8, 128>}]} {
    %c0 = arith.constant 0 : index
    %c0_0 = arith.constant 0 : index
    %c0_1 = arith.constant 0 : index
    %0 = vector.load %arg1[%c0, %c0_0, %c0_1] : memref<4x16x32xf32, #tpu.memory_space<vmem>>, vector<4x16x32xf32>
    %1 = vector.shape_cast %0 : vector<4x16x32xf32> to vector<64x32xf32>
    %c0_2 = arith.constant 0 : index
    %c0_3 = arith.constant 0 : index
    %c0_4 = arith.constant 0 : index
    %2 = vector.load %arg2[%c0_2, %c0_3, %c0_4] : memref<4x8x32xf32, #tpu.memory_space<vmem>>, vector<4x8x32xf32>
    %3 = vector.shape_cast %2 : vector<4x8x32xf32> to vector<32x32xf32>
    %c0_5 = arith.constant 0 : index
    %c0_6 = arith.constant 0 : index
    %4 = vector.load %arg3[%c0_5, %c0_6] : memref<32x128xf32, #tpu.memory_space<vmem>>, vector<32x128xf32>
    %cst = arith.constant dense<0.000000e+00> : vector<64x128xf32>
    %5 = tpu.matmul %1, %4, %cst {dimension_numbers = #tpu.dot_dimension_numbers<[1], [0], [0], [1], [0, 0, 1, 1], [], []>} : vector<64x32xf32>, vector<32x128xf32>, vector<64x128xf32> -> vector<64x128xf32>
    %c0_7 = arith.constant 0 : index
    %c0_8 = arith.constant 0 : index
    %6 = vector.load %arg4[%c0_7, %c0_8] : memref<1x128xf32, #tpu.memory_space<vmem>>, vector<1x128xf32>
    %7 = vector.broadcast %6 : vector<1x128xf32> to vector<64x128xf32>
    %8 = arith.addf %5, %7 : vector<64x128xf32>
    %cst_9 = arith.constant 0.000000e+00 : f32
    %9 = vector.broadcast %cst_9 : f32 to vector<64x128xf32>
    %10 = arith.maximumf %8, %9 : vector<64x128xf32>
    %c0_10 = arith.constant 0 : index
    %c0_11 = arith.constant 0 : index
    %11 = vector.load %arg5[%c0_10, %c0_11] : memref<32x128xf32, #tpu.memory_space<vmem>>, vector<32x128xf32>
    %cst_12 = arith.constant dense<0.000000e+00> : vector<32x128xf32>
    %12 = tpu.matmul %3, %11, %cst_12 {dimension_numbers = #tpu.dot_dimension_numbers<[1], [0], [0], [1], [0, 0, 1, 1], [], []>} : vector<32x32xf32>, vector<32x128xf32>, vector<32x128xf32> -> vector<32x128xf32>
    %c0_13 = arith.constant 0 : index
    %c0_14 = arith.constant 0 : index
    %13 = vector.load %arg6[%c0_13, %c0_14] : memref<1x128xf32, #tpu.memory_space<vmem>>, vector<1x128xf32>
    %14 = vector.broadcast %13 : vector<1x128xf32> to vector<32x128xf32>
    %15 = arith.addf %12, %14 : vector<32x128xf32>
    %cst_15 = arith.constant 0.000000e+00 : f32
    %16 = vector.broadcast %cst_15 : f32 to vector<32x128xf32>
    %17 = arith.maximumf %15, %16 : vector<32x128xf32>
    %c0_16 = arith.constant 0 : index
    %c0_17 = arith.constant 0 : index
    %18 = vector.load %arg7[%c0_16, %c0_17] : memref<8x128xf32, #tpu.memory_space<vmem>>, vector<8x128xf32>
    %c0_18 = arith.constant 0 : index
    %c0_19 = arith.constant 0 : index
    %19 = vector.load %arg8[%c0_18, %c0_19] : memref<8x1xf32, #tpu.memory_space<vmem>>, vector<8x1xf32>
    %20 = vector.shape_cast %19 : vector<8x1xf32> to vector<8x1xf32>
    %21 = vector.broadcast %20 : vector<8x1xf32> to vector<8x128xf32>
    %22 = vector.extract_strided_slice %10 {offsets = [0, 0], sizes = [16, 128], strides = [1, 1]} : vector<64x128xf32> to vector<16x128xf32>
    %23 = vector.extract_strided_slice %17 {offsets = [0, 0], sizes = [8, 128], strides = [1, 1]} : vector<32x128xf32> to vector<8x128xf32>
    %24 = vector.shape_cast %22 : vector<16x128xf32> to vector<16x1x128xf32>
    %25 = vector.shape_cast %23 : vector<8x128xf32> to vector<1x8x128xf32>
    %26 = vector.broadcast %24 : vector<16x1x128xf32> to vector<16x8x128xf32>
    %27 = vector.broadcast %25 : vector<1x8x128xf32> to vector<16x8x128xf32>
    %28 = arith.mulf %26, %27 : vector<16x8x128xf32>
    %29 = vector.shape_cast %28 : vector<16x8x128xf32> to vector<128x128xf32>
    %cst_20 = arith.constant dense<0.000000e+00> : vector<8x128xf32>
    %30 = tpu.matmul %18, %29, %cst_20 {dimension_numbers = #tpu.dot_dimension_numbers<[1], [1], [0], [0], [0, 0, 1, 0], [], []>} : vector<8x128xf32>, vector<128x128xf32>, vector<8x128xf32> -> vector<8x128xf32>
    %31 = arith.addf %30, %21 : vector<8x128xf32>
    %c0_21 = arith.constant 0 : index
    %c0_22 = arith.constant 0 : index
    %c0_23 = arith.constant 0 : index
    %32 = vector.load %arg9[%c0_21, %c0_22, %c0_23] : memref<4x8x128xf32, #tpu.memory_space<vmem>>, vector<1x8x128xf32>
    %33 = vector.shape_cast %32 : vector<1x8x128xf32> to vector<8x128xf32>
    %34 = vector.shape_cast %31 : vector<8x128xf32> to vector<1x8x128xf32>
    tpu.vector_store %arg9[%c0_21, %c0_22, %c0_23], %34 {strides = array<i32>} : memref<4x8x128xf32, #tpu.memory_space<vmem>>, vector<1x8x128xf32>,
    %35 = vector.extract_strided_slice %10 {offsets = [16, 0], sizes = [16, 128], strides = [1, 1]} : vector<64x128xf32> to vector<16x128xf32>
    %36 = vector.extract_strided_slice %17 {offsets = [8, 0], sizes = [8, 128], strides = [1, 1]} : vector<32x128xf32> to vector<8x128xf32>
    %37 = vector.shape_cast %35 : vector<16x128xf32> to vector<16x1x128xf32>
    %38 = vector.shape_cast %36 : vector<8x128xf32> to vector<1x8x128xf32>
    %39 = vector.broadcast %37 : vector<16x1x128xf32> to vector<16x8x128xf32>
    %40 = vector.broadcast %38 : vector<1x8x128xf32> to vector<16x8x128xf32>
    %41 = arith.mulf %39, %40 : vector<16x8x128xf32>
    %42 = vector.shape_cast %41 : vector<16x8x128xf32> to vector<128x128xf32>
    %cst_24 = arith.constant dense<0.000000e+00> : vector<8x128xf32>
    %43 = tpu.matmul %18, %42, %cst_24 {dimension_numbers = #tpu.dot_dimension_numbers<[1], [1], [0], [0], [0, 0, 1, 0], [], []>} : vector<8x128xf32>, vector<128x128xf32>, vector<8x128xf32> -> vector<8x128xf32>
    %44 = arith.addf %43, %21 : vector<8x128xf32>
    %c1 = arith.constant 1 : index
    %c0_25 = arith.constant 0 : index
    %c0_26 = arith.constant 0 : index
    %45 = vector.load %arg9[%c1, %c0_25, %c0_26] : memref<4x8x128xf32, #tpu.memory_space<vmem>>, vector<1x8x128xf32>
    %46 = vector.shape_cast %45 : vector<1x8x128xf32> to vector<8x128xf32>
    %47 = vector.shape_cast %44 : vector<8x128xf32> to vector<1x8x128xf32>
    tpu.vector_store %arg9[%c1, %c0_25, %c0_26], %47 {strides = array<i32>} : memref<4x8x128xf32, #tpu.memory_space<vmem>>, vector<1x8x128xf32>,
    %48 = vector.extract_strided_slice %10 {offsets = [32, 0], sizes = [16, 128], strides = [1, 1]} : vector<64x128xf32> to vector<16x128xf32>
    %49 = vector.extract_strided_slice %17 {offsets = [16, 0], sizes = [8, 128], strides = [1, 1]} : vector<32x128xf32> to vector<8x128xf32>
    %50 = vector.shape_cast %48 : vector<16x128xf32> to vector<16x1x128xf32>
    %51 = vector.shape_cast %49 : vector<8x128xf32> to vector<1x8x128xf32>
    %52 = vector.broadcast %50 : vector<16x1x128xf32> to vector<16x8x128xf32>
    %53 = vector.broadcast %51 : vector<1x8x128xf32> to vector<16x8x128xf32>
    %54 = arith.mulf %52, %53 : vector<16x8x128xf32>
    %55 = vector.shape_cast %54 : vector<16x8x128xf32> to vector<128x128xf32>
    %cst_27 = arith.constant dense<0.000000e+00> : vector<8x128xf32>
    %56 = tpu.matmul %18, %55, %cst_27 {dimension_numbers = #tpu.dot_dimension_numbers<[1], [1], [0], [0], [0, 0, 1, 0], [], []>} : vector<8x128xf32>, vector<128x128xf32>, vector<8x128xf32> -> vector<8x128xf32>
    %57 = arith.addf %56, %21 : vector<8x128xf32>
    %c2 = arith.constant 2 : index
    %c0_28 = arith.constant 0 : index
    %c0_29 = arith.constant 0 : index
    %58 = vector.load %arg9[%c2, %c0_28, %c0_29] : memref<4x8x128xf32, #tpu.memory_space<vmem>>, vector<1x8x128xf32>
    %59 = vector.shape_cast %58 : vector<1x8x128xf32> to vector<8x128xf32>
    %60 = vector.shape_cast %57 : vector<8x128xf32> to vector<1x8x128xf32>
    tpu.vector_store %arg9[%c2, %c0_28, %c0_29], %60 {strides = array<i32>} : memref<4x8x128xf32, #tpu.memory_space<vmem>>, vector<1x8x128xf32>,
    %61 = vector.extract_strided_slice %10 {offsets = [48, 0], sizes = [16, 128], strides = [1, 1]} : vector<64x128xf32> to vector<16x128xf32>
    %62 = vector.extract_strided_slice %17 {offsets = [24, 0], sizes = [8, 128], strides = [1, 1]} : vector<32x128xf32> to vector<8x128xf32>
    %63 = vector.shape_cast %61 : vector<16x128xf32> to vector<16x1x128xf32>
    %64 = vector.shape_cast %62 : vector<8x128xf32> to vector<1x8x128xf32>
    %65 = vector.broadcast %63 : vector<16x1x128xf32> to vector<16x8x128xf32>
    %66 = vector.broadcast %64 : vector<1x8x128xf32> to vector<16x8x128xf32>
    %67 = arith.mulf %65, %66 : vector<16x8x128xf32>
    %68 = vector.shape_cast %67 : vector<16x8x128xf32> to vector<128x128xf32>
    %cst_30 = arith.constant dense<0.000000e+00> : vector<8x128xf32>
    %69 = tpu.matmul %18, %68, %cst_30 {dimension_numbers = #tpu.dot_dimension_numbers<[1], [1], [0], [0], [0, 0, 1, 0], [], []>} : vector<8x128xf32>, vector<128x128xf32>, vector<8x128xf32> -> vector<8x128xf32>
    %70 = arith.addf %69, %21 : vector<8x128xf32>
    %c3 = arith.constant 3 : index
    %c0_31 = arith.constant 0 : index
    %c0_32 = arith.constant 0 : index
    %71 = vector.load %arg9[%c3, %c0_31, %c0_32] : memref<4x8x128xf32, #tpu.memory_space<vmem>>, vector<1x8x128xf32>
    %72 = vector.shape_cast %71 : vector<1x8x128xf32> to vector<8x128xf32>
    %73 = vector.shape_cast %70 : vector<8x128xf32> to vector<1x8x128xf32>
    tpu.vector_store %arg9[%c3, %c0_31, %c0_32], %73 {strides = array<i32>} : memref<4x8x128xf32, #tpu.memory_space<vmem>>, vector<1x8x128xf32>,
    return
  }
  func.func @transform_0(%arg0: i32) -> (i32, i32, i32) {
    %c0_i32 = arith.constant 0 : i32
    %c0_i32_0 = arith.constant 0 : i32
    %c0_i32_1 = arith.constant 0 : i32
    return %arg0, %c0_i32, %c0_i32_0 : i32, i32, i32
  }
  func.func @transform_1(%arg0: i32) -> (i32, i32, i32) {
    %c0_i32 = arith.constant 0 : i32
    %c0_i32_0 = arith.constant 0 : i32
    %c0_i32_1 = arith.constant 0 : i32
    return %arg0, %c0_i32, %c0_i32_0 : i32, i32, i32
  }
  func.func @transform_2(%arg0: i32) -> (i32, i32) {
    %c0_i32 = arith.constant 0 : i32
    %c0_i32_0 = arith.constant 0 : i32
    %c0_i32_1 = arith.constant 0 : i32
    return %c0_i32, %c0_i32_0 : i32, i32
  }
  func.func @transform_3(%arg0: i32) -> (i32, i32) {
    %c0_i32 = arith.constant 0 : i32
    %c0_i32_0 = arith.constant 0 : i32
    %c0_i32_1 = arith.constant 0 : i32
    return %c0_i32, %c0_i32_0 : i32, i32
  }
  func.func @transform_4(%arg0: i32) -> (i32, i32) {
    %c0_i32 = arith.constant 0 : i32
    %c0_i32_0 = arith.constant 0 : i32
    %c0_i32_1 = arith.constant 0 : i32
    return %c0_i32, %c0_i32_0 : i32, i32
  }
  func.func @transform_5(%arg0: i32) -> (i32, i32) {
    %c0_i32 = arith.constant 0 : i32
    %c0_i32_0 = arith.constant 0 : i32
    %c0_i32_1 = arith.constant 0 : i32
    return %c0_i32, %c0_i32_0 : i32, i32
  }
  func.func @transform_6(%arg0: i32) -> (i32, i32) {
    %c0_i32 = arith.constant 0 : i32
    %c0_i32_0 = arith.constant 0 : i32
    %c0_i32_1 = arith.constant 0 : i32
    return %c0_i32, %c0_i32_0 : i32, i32
  }
  func.func @transform_7(%arg0: i32) -> (i32, i32) {
    %c0_i32 = arith.constant 0 : i32
    %c0_i32_0 = arith.constant 0 : i32
    %c0_i32_1 = arith.constant 0 : i32
    return %c0_i32, %c0_i32_0 : i32, i32
  }
  func.func @transform_8(%arg0: i32) -> (i32, i32, i32) {
    %c0_i32 = arith.constant 0 : i32
    %c0_i32_0 = arith.constant 0 : i32
    %c0_i32_1 = arith.constant 0 : i32
    return %arg0, %c0_i32, %c0_i32_0 : i32, i32, i32
  }
}

</mosaic_0001>

<bundles_post_ra>
// kernel: tpu_custom_call.1
= control target key start
LH: loop header
LB: loop body
LE: loop exit
PB: predicated region body
PF: predicated region fallthrough
CT: control target
= control target key end

     0   :  { %s1815_s0 = inlined_call_operand.hbm [shape: f32[8,16,32], index: 0, kind: input, shape index: {}]   ;;  %s1816_s1 = inlined_call_operand.hbm [shape: f32[8,8,32], index: 1, kind: input, shape index: {}]   ;;  %s1817_s2 = inlined_call_operand.hbm [shape: f32[32,128], index: 2, kind: input, shape index: {}]   ;;  %s1818_s3 = inlined_call_operand.vmem [shape: f32[1,128], index: 3, kind: input, shape index: {}]   ;;  %s1819_s4 = inlined_call_operand.hbm [shape: f32[32,128], index: 4, kind: input, shape index: {}]   ;;  %s1820_s5 = inlined_call_operand.vmem [shape: f32[1,128], index: 5, kind: input, shape index: {}]   ;;  %s1821_s6 = inlined_call_operand.vmem [shape: f32[8,128], index: 6, kind: input, shape index: {}]   ;;  %s1822_s7 = inlined_call_operand.vmem [shape: f32[8,1], index: 7, kind: input, shape index: {}]   ;;  %s1823_s8 = inlined_call_operand.hbm [shape: f32[8,8,128], index: 8, kind: output, shape index: {}]  }
   0x1   :  { %1833 = sst [smem:[#allocation21_spill]] %s1817_s2 }
   0x2   :  { %1834 = sst [smem:[#allocation22_spill]] %s1819_s4 }
   0x3   :  { %13 = vsyncpa [#allocation3], 0 }
   0x4   :  { %15 = vsyncpa [#allocation3 + $0x1], 0 }
   0x5   :  { %16 = vsyncpa [#allocation6], 0 }
   0x6   :  { %18 = vsyncpa [#allocation6 + $0x1], 0 }
   0x7   :  { %19 = vsyncpa [#allocation9], 0 }
   0x8   :  { %20 = vsyncpa [#allocation4], 0 }
   0x9   :  { %22 = vsyncpa [#allocation4 + $0x1], 0  ;;  %s1407_s27 = smov 0   ;;  %s1409_s28 = smov 0  }
   0xa   :  { %s1411_s29 = smov 0   ;;  %s1413_s30 = smov 0  }
   0xb LB: > { %1835 = sst [smem:[#allocation16_spill]] %s1341_s27  ;;  %s1428_s9 = sadd.s32 4294967295, %s1353_s30   ;;  %s1353_s30 = sphi %s1413_s30, %s1852_s30   ;;  %s1349_s29 = sphi %s1411_s29, %s1854_s29   ;;  %s1345_s28 = sphi %s1409_s28, %s1856_s28   ;;  %s1341_s27 = sphi %s1407_s27, %s1855_s27  }
   0xc   : > { %1836 = sst [smem:[#allocation17_spill]] %s1349_s29  ;;  %s1033_s10 = sadd.s32 4294967294, %s1353_s30  }
   0xd   : > { %p48_p0 = scmp.ne.s32.totalorder %s1345_s28, %s1341_s27  ;;  %p49_p1 = scmp.eq.s32.totalorder %s1428_s9, 0 }
   0xe   : > { %p224_p2 = scmp.eq.s32.totalorder %s1428_s9, 1  ;;  %p230_p3 = scmp.eq.s32.totalorder %s1033_s10, 1 }
   0xf   : > { %p1437_p4 = por %p49_p1, %p48_p0  ;;  %p1034_p5 = scmp.ge.s32.totalorder %s1353_s30, 1 }
  0x10   : > { %p1442_p6 = por %p230_p3, %p48_p0  ;;  %p237_p7 = scmp.lt.s32.totalorder %s1353_s30, 3 }
  0x11   : > { %s1840_s2 = sld [smem:[#allocation21_spill]]  ;;  %s1355_s17 = smov [#allocation7]  }
  0x12   : > { %s1838_s12 = scalar_select %p1442_p6, 1, 0 }
  0x13   : > { %p1450_p8 = pnand %p1034_p5, %p237_p7  ;;  %s250_s18 = sshll.u32 %s1355_s17, 4  ;;  %s251_s18 = int_to_ptr.vmem [resolvable:$true] %s250_s18 }
  0x14   : > { %1839 = sst [smem:[#allocation18_spill]] %s1838_s12  ;;  %s1824_s22 = smov 128  }
  0x15   : > { %p1089_p9 = pneg %p1450_p8  ;;  %s1842_s4 = sld [smem:[#allocation22_spill]] }
  0x16   : > { %s1826_s23 = smov 8   ;;  %s1358_s24 = smov [#allocation8]  }
  0x17   : > { %s248_s15 = sshll.u32 %s1840_s2, 4  ;;  %p1090_p10 = pnand %p1089_p9, %p49_p1  ;;  %s249_s15 = int_to_ptr.hbm [resolvable:$true] %s248_s15 }
  0x18   : > { %s267_s25 = sshll.u32 %s1358_s24, 4  ;;  %s1469_s26 = sadd.s32 1, %s1353_s30   ;;  %s268_s25 = int_to_ptr.vmem [resolvable:$true] %s267_s25 }
  0x19   : > { %1092 = dma.hbm_to_vmem [thread:$0]  (!%p1090_p10), %s249_s15, 512, %s251_s18, [#allocation6], %s1824_s22, %s1824_s22, %s1826_s23  }
  0x1a   : > { %1843 = sst [smem:[#allocation19_spill]] %s1469_s26  ;;  %s35_s10 = sadd.s32 1, %s1349_s29 }
  0x1b   : > { %s265_s21 = sshll.u32 %s1842_s4, 4  ;;  %s32_s13 = ssub.s32 %s1353_s30, %s1469_s26  ;;  %s266_s21 = int_to_ptr.hbm [resolvable:$true] %s265_s21 }
  0x1c   : > { %1095 = dma.hbm_to_vmem [thread:$0]  (!%p1090_p10), %s266_s21, 512, %s268_s25, [#allocation9], %s1824_s22, %s1824_s22, %s1826_s23  }
  0x1d   : > { %p42_p12 = scmp.ne.s32.totalorder %s1349_s29, %s1345_s28  ;;  %p33_p13 = scmp.eq.s32.totalorder %s32_s13, 0 }
  0x1e   : > { %p43_p0 = scmp.eq.s32.totalorder %s1353_s30, 0  ;;  %p1109_p5 = scmp.lt.s32.totalorder %s1353_s30, 2 }
  0x1f   : > { %p1479_p3 = por %p224_p2, %p42_p12  ;;  %s1488_s17 = sand.u32 1, %s1349_s29  }
  0x20   : > { %s1485_s15 = scalar_select %p33_p13, %s1349_s29, %s35_s10  }
  0x21   : > { %p44_p7 = por %p43_p0, %p42_p12  ;;  %s1038_s18 = sshll.u32 %s1488_s17, 6 }
  0x22   : > { %1845 = sst [smem:[#allocation20_spill]] %s1485_s15  ;;  %s1072_s19 = sshll.u32 %s1353_s30, 6 }
  0x23   : > { %s300_s24 = scalar_lea.hbm %s1815_s0, %s1072_s19  ;;  %s294_s25 = scalar_lea.vmem [#allocation2], %s1038_s18 }
  0x24   : > { %s303_s13 = sshll.u32 %s294_s25, 4  ;;  %s301_s22 = sshll.u32 %s300_s24, 4  ;;  %s304_s13 = int_to_ptr.vmem [resolvable:$true] %s303_s13  ;;  %s302_s22 = int_to_ptr.hbm [resolvable:$true] %s301_s22 }
  0x25   : > { %p1495_p2 = pnand %p1109_p5, %p44_p7  ;;  %s313_s23 = sand.u32 1, %s1353_s30  }
  0x26   : > { %s1042_s2 = sshll.u32 %s1488_s17, 5  ;;  %s291_s4 = scalar_lea.sflag [#allocation3], %s1488_s17 }
  0x27   : > { %s1215_s15 = sshra.s32 %s302_s22, 4  ;;  %p1219_p10 = pneg %p1495_p2  ;;  %s1216_s15 = int_to_ptr.hbm [resolvable:$true] %s1215_s15 }
  0x28   : > { %s1217_s29 = scalar_lea.hbm %s1216_s15, 64  ;;  %s1222_s20 = scalar_lea.hbm %s1815_s0, 128 }
  0x29   : > { %p1218_p9 = scmp.ne.s32.totalorder %s1216_s15, %s1217_s29  ;;  %p1223_p0 = scmp.lt.s32.totalorder %s1216_s15, %s1815_s0 }
  0x2a   : > { %p1224_p5 = scmp.lt.s32.totalorder %s1222_s20, %s1217_s29 }
  0x2b   : > { %p1220_p12 = pnand %p1219_p10, %p1218_p9 }
  0x2c   : > { %p1225_p7 = por %p1224_p5, %p1223_p0 }
  0x2d   : > { %p1221_p13 = pneg %p1220_p12 }
  0x2f   : > { %p1226_p11 = pnand %p1225_p7, %p1221_p13 }
  0x31   : > { %1229 = shalt.err (!%p1226_p11)
}
  0x32   : > { %s1847_s17 = smov 8   ;;  %s1848_s25 = smov 128  }
  0x33   : > { %1099 = dma.hbm_to_vmem [thread:$0]  (!%p1495_p2), %s302_s22, 1024, %s304_s13, %s291_s4, %s1848_s25, %s1848_s25, %s1847_s17  }
  0x34   : > { %s1073_s26 = sshll.u32 %s1353_s30, 5  ;;  %s317_s27 = scalar_lea.vmem [#allocation5], %s1042_s2 }
  0x35   : > { %s322_s19 = scalar_lea.hbm %s1816_s1, %s1073_s26  ;;  %s325_s21 = sshll.u32 %s317_s27, 4  ;;  %s326_s21 = int_to_ptr.vmem [resolvable:$true] %s325_s21 }
  0x36   : > { %s323_s15 = sshll.u32 %s322_s19, 4  ;;  %s314_s29 = scalar_lea.sflag [#allocation6], %s313_s23  ;;  %s324_s15 = int_to_ptr.hbm [resolvable:$true] %s323_s15 }
  0x37   : > { %s1245_s20 = sshra.s32 %s324_s15, 4  ;;  %s1252_s13 = scalar_lea.hbm %s1816_s1, 64  ;;  %s1246_s20 = int_to_ptr.hbm [resolvable:$true] %s1245_s20 }
  0x38   : > { %s1247_s24 = scalar_lea.hbm %s1246_s20, 32  ;;  %p1253_p13 = scmp.lt.s32.totalorder %s1246_s20, %s1816_s1 }
  0x39   : > { %p1248_p11 = scmp.ne.s32.totalorder %s1246_s20, %s1247_s24  ;;  %p1254_p0 = scmp.lt.s32.totalorder %s1252_s13, %s1247_s24 }
  0x3b   : > { %p1250_p9 = pnand %p1248_p11, %p1219_p10  ;;  %p1255_p5 = por %p1254_p0, %p1253_p13 }
  0x3d   : > { %p1251_p12 = pneg %p1250_p9 }
  0x3f   : > { %p1256_p7 = pnand %p1255_p5, %p1251_p12 }
  0x41   : > { %1259 = shalt.err (!%p1256_p7)
}
  0x42   : > { %1102 = dma.hbm_to_vmem [thread:$0]  (!%p1495_p2), %s324_s15, 512, %s326_s21, %s314_s29, %s1848_s25, %s1848_s25, %s1847_s17  }
  0x43   : > { %337 = sbr.rel (%p1450_p8) target bundleno = 476 (0x1dc), region = 52  ;;  %s1539_s2 = sand.u32 (!%p1450_p8), 1, %s1345_s28  }
  0x44   : > { %s1046_s27 = sshll.u32 (!%p1450_p8), %s1539_s2, 6  ;;  %s340_s23 = scalar_lea.sflag (!%p1450_p8), [#allocation3], %s1539_s2 }
  0x45   : > { %s1543_s18 = scalar_lea.vmem (!%p1450_p8), [#allocation2], %s1046_s27 }
  0x48   : > { %1320 = dma.done.wait (%p1437_p4), %s340_s23, 1024  }
  0x49   : > { %1322 = vsyncadd (%p1437_p4), %s340_s23, 4294966272  ;;  %s349_s16 = sand.u32 1, %s1428_s9   ;;  %s1047_s10 = sshll.u32 %s1539_s2, 5 }
  0x4a   : > { %s350_s17 = scalar_lea.sflag [#allocation6], %s349_s16  ;;  %s1553_s25 = scalar_lea.vmem [#allocation5], %s1047_s10 }
  0x4b   : > { %1324 = dma.done.wait (%p1437_p4), %s350_s17, 512  }
  0x4c   : > { %1326 = vsyncadd (%p1437_p4), %s350_s17, 4294966784 }
  0x4d   : > { %1328 = dma.done.wait (%p49_p1), [#allocation6], 512  }
  0x4e   : > { %1330 = vsyncadd (%p49_p1), [#allocation6], 4294966784 }
  0x4f   : > { %1332 = dma.done.wait (%p49_p1), [#allocation9], 512  }
  0x50   : > { %1334 = vsyncadd (%p49_p1), [#allocation9], 4294966784  ;;  %v420_v0 = vld [vmem:[#allocation7 + $0x18] sm:$0xff]  ;;  %v419_v1 = vld [vmem:[#allocation7 + $0x10] sm:$0xff]  ;;  %vm425_vm0 = vcmask 261120   ;;  %s401_s22 = scalar_lea.vmem [#allocation10], %s1047_s10 }
  0x51   : > { %v502_v2 = vld [vmem:[#allocation8 + $0x18] sm:$0xff]  ;;  %462 = vmatpush.msra.mxu0 %v420_v0  ;;  %v501_v3 = vld [vmem:[#allocation8 + $0x10] sm:$0xff]  ;;  %v418_v4 = vld [vmem:[#allocation7 + $0x8] sm:$0xff]  ;;  %s1074_s13 = sshll.u32 %s1428_s9, 5  ;;  %s915_s23 = sshll.u32 %s401_s22, 4  ;;  %s916_s23 = int_to_ptr.vmem [resolvable:$true] %s915_s23 }
  0x52   : > { %531 = vmatpush.msra.mxu1 %v502_v2  ;;  %v500_v5 = vld [vmem:[#allocation8 + $0x8] sm:$0xff]  ;;  %v417_v6 = vld [vmem:[#allocation7] sm:$0xff]  ;;  %v407_v12 = vld [vmem:[%s1543_s18 + $0x10] sm:$0xff]  ;;  %s914_s27 = scalar_lea.hbm %s1823_s8, %s1074_s13  ;;  %s903_s16 = scalar_lea.sflag [#allocation4], %s1539_s2 }
  0x53   : > { %463 = vmatpush.msra.mxu0 %v419_v1  ;;  %v405_v7 = vld [vmem:[%s1543_s18] sm:$0xff]  ;;  %v406_v10 = vld [vmem:[%s1543_s18 + $0x8] sm:$0xff]  ;;  %v415_v13 = vld [vmem:[%s1553_s25 + $0x10] sm:$0xff]  ;;  %s1295_s11 = scalar_lea.hbm %s1823_s8, 64 }
  0x54   : > { %532 = vmatpush.msra.mxu1 %v501_v3  ;;  %v499_v8 = vld [vmem:[#allocation8] sm:$0xff]  ;;  %v414_v11 = vld [vmem:[%s1553_s25 + $0x8] sm:$0xff]  ;;  %v408_v14 = vld [vmem:[%s1543_s18 + $0x18] sm:$0xff] }
  0x55   : > { %464 = vmatpush.msra.mxu0 %v418_v4  ;;  %v413_v9 = vld [vmem:[%s1553_s25] sm:$0xff]  ;;  %v416_v15 = vld [vmem:[%s1553_s25 + $0x18] sm:$0xff]  ;;  %v410_v17 = vld [vmem:[%s1543_s18 + $0x28] sm:$0xff] }
  0x56   : > { %533 = vmatpush.msra.mxu1 %v500_v5  ;;  %v409_v16 = vld [vmem:[%s1543_s18 + $0x20] sm:$0xff]  ;;  %v411_v18 = vld [vmem:[%s1543_s18 + $0x30] sm:$0xff]  ;;  %v412_v19 = vld [vmem:[%s1543_s18 + $0x38] sm:$0xff]  ;;  %s917_s18 = sshll.u32 %s914_s27, 4  ;;  %s918_s18 = int_to_ptr.hbm [resolvable:$true] %s917_s18 }
  0x57   : > { %465 = vmatpush.msra.mxu0 %v417_v6  ;;  %v1594_v21 = vld [vmem:[%s1818_s3] ss:$0 sm:$0xff]  ;;  %s1289_s10 = sshra.s32 %s918_s18, 4  ;;  %s1290_s10 = int_to_ptr.hbm [resolvable:$true] %s1289_s10 }
  0x58   : > { %534 = vmatpush.msra.mxu1 %v499_v8  ;;  %1051 = vmatmul.msk.f32.vlgmr.msra.gmra.mxu0 %vm425_vm0, %v405_v7  ;;  %v1599_v22 = vld [vmem:[%s1820_s5] ss:$0 sm:$0xff]  ;;  %s1291_s17 = scalar_lea.hbm %s1290_s10, 32  ;;  %p1296_p2 = scmp.lt.s32.totalorder %s1290_s10, %s1823_s8 }
  0x59   : > { %1059 = vmatmul.msk.f32.vlgmr.msra.gmra.mxu1 %vm425_vm0, %v413_v9  ;;  %p1292_p1 = scmp.ne.s32.totalorder %s1290_s10, %s1291_s17  ;;  %p1297_p10 = scmp.lt.s32.totalorder %s1295_s11, %s1291_s17 }
  0x5b   : > { %p1293_p4 = pnand %p1292_p1, %p1479_p3  ;;  %p1298_p11 = por %p1297_p10, %p1296_p2 }
  0x5d   : > { %p1294_p8 = pneg %p1293_p4 }
  0x5f   : > { %p1299_p9 = pnand %p1298_p11, %p1294_p8 }
  0x60   : > { %1052 = vmatmul.msk.f32.gmra.mxu0 %vm425_vm0, %v406_v10 }
  0x61   : > { %1060 = vmatmul.msk.f32.gmra.mxu1 %vm425_vm0, %v414_v11 }
  0x68   : > { %1053 = vmatmul.msk.f32.gmra.mxu0 %vm425_vm0, %v407_v12 }
  0x69   : > { %1061 = vmatmul.msk.f32.gmra.mxu1 %vm425_vm0, %v415_v13 }
  0x70   : > { %1054 = vmatmul.msk.f32.gmra.mxu0 %vm425_vm0, %v408_v14 }
  0x71   : > { %1062 = vmatmul.msk.f32.gmra.mxu1 %vm425_vm0, %v416_v15 }
  0x78   : > { %1055 = vmatmul.msk.f32.gmra.mxu0 %vm425_vm0, %v409_v16 }
  0x80   : > { %1056 = vmatmul.msk.f32.gmra.mxu0 %vm425_vm0, %v410_v17 }
  0x88   : > { %1057 = vmatmul.msk.f32.gmra.mxu0 %vm425_vm0, %v411_v18 }
  0x90   : > { %1058 = vmatmul.msk.f32.gmra.mxu0 %vm425_vm0, %v412_v19 }
  0xd5   : > { %v467_v20 = vpop.f32.mrf.mxu0 }
  0xd6   : > { %v536_v23 = vpop.f32.mrf.mxu1  ;;  %v468_v54 = vadd.f32 %v1594_v21, %v467_v20 }
  0xd7   : > { %v537_v26 = vadd.f32 %v1599_v22, %v536_v23 }
  0xd8   : > { %v1634_v62 = vmax.f32 %v468_v54, 0.0 }
  0xd9   : > { %v1607_v30 = vmax.f32 %v537_v26, 0.0 }
  0xda   : > { %v567_v8 = vrot.slane %v1634_v62, 7  ;;  %v566_v17 = vrot.slane %v1634_v62, 6  ;;  %v563_v54 = vrot.slane %v1634_v62, 3 }
  0xdc   : > { %v582_v16 = vperm.slane %v567_v8, 0 }
  0xdd   : > { %v470_v24 = vpop.f32.mrf.mxu0 }
  0xde   : > { %v471_v25 = vadd.f32 %v1594_v21, %v470_v24  ;;  %v539_v39 = vpop.f32.mrf.mxu1 }
  0xdf   : > { %v540_v45 = vadd.f32 %v1599_v22, %v539_v39 }
  0xe0   : > { %v1603_v27 = vmax.f32 %v471_v25, 0.0 }
  0xe1   : > { %v1625_v52 = vmax.f32 %v540_v45, 0.0 }
  0xe2   : > { %v574_v28 = vrot.slane %v1603_v27, 7  ;;  %v573_v29 = vrot.slane %v1603_v27, 6  ;;  %v572_v35 = vrot.slane %v1603_v27, 5  ;;  %v571_v38 = vrot.slane %v1603_v27, 4 }
  0xe3   : > { %v570_v44 = vrot.slane %v1603_v27, 3  ;;  %v569_v47 = vrot.slane %v1603_v27, 2  ;;  %v568_v57 = vrot.slane %v1603_v27, 1  ;;  %v583_v7 = vperm.slane %v1603_v27, 0 }
  0xe4   : > { %v590_v31 = vperm.slane %v574_v28, 0  ;;  %v589_v34 = vperm.slane %v573_v29, 0  ;;  %v588_v37 = vperm.slane %v572_v35, 0  ;;  %v587_v43 = vperm.slane %v571_v38, 0 }
  0xe5   : > { %v1609_v32 = vpop.f32.mrf.mxu0  ;;  %v586_v49 = vperm.slane %v570_v44, 0  ;;  %v585_v56 = vperm.slane %v569_v47, 0  ;;  %v584_v63 = vperm.slane %v568_v57, 0  ;;  %v615_v15 = vmul.f32 %v583_v7, %v1607_v30 }
  0xe6   : > { %v622_v33 = vmul.f32 %v590_v31, %v1607_v30  ;;  %v621_v36 = vmul.f32 %v589_v34, %v1607_v30  ;;  %v620_v42 = vmul.f32 %v588_v37, %v1607_v30  ;;  %v619_v48 = vmul.f32 %v587_v43, %v1607_v30  ;;  %v542_v4 = vpop.f32.mrf.mxu1 }
  0xe7   : > { %v618_v58 = vmul.f32 %v586_v49, %v1607_v30  ;;  %v617_v0 = vmul.f32 %v585_v56, %v1607_v30  ;;  %v616_v6 = vmul.f32 %v584_v63, %v1607_v30  ;;  %v543_v13 = vadd.f32 %v1599_v22, %v542_v4 }
  0xe8   : > { %623 = vmatpush.xpose.msra.mxu2 %v622_v33  ;;  %v474_v27 = vadd.f32 %v1594_v21, %v1609_v32  ;;  %v614_v29 = vmul.f32 %v582_v16, %v1607_v30  ;;  %v581_v31 = vperm.slane %v566_v17, 0  ;;  %v565_v33 = vrot.slane %v1634_v62, 5 }
  0xe9   : > { %v1654_v25 = vmax.f32 %v543_v13, 0.0  ;;  %v561_v13 = vrot.slane %v1634_v62, 1 }
  0xea   : > { %v580_v32 = vperm.slane %v565_v33, 0 }
  0xec   : > { %624 = vmatpush.xpose.msra.mxu2 %v621_v36 }
  0xed   : > { %v476_v40 = vpop.f32.mrf.mxu0 }
  0xee   : > { %v477_v41 = vadd.f32 %v1594_v21, %v476_v40  ;;  %v564_v40 = vrot.slane %v1634_v62, 4  ;;  %v545_v49 = vpop.f32.mrf.mxu1 }
  0xf0   : > { %v1619_v46 = vmax.f32 %v477_v41, 0.0  ;;  %625 = vmatpush.xpose.msra.mxu2 %v620_v42  ;;  %v1667_v41 = vmax.f32 %v474_v27, 0.0  ;;  %v613_v42 = vmul.f32 %v581_v31, %v1607_v30 }
  0xf2   : > { %v659_v50 = vrot.slane %v1619_v46, 7  ;;  %v658_v51 = vrot.slane %v1619_v46, 6  ;;  %v657_v61 = vrot.slane %v1619_v46, 5  ;;  %v656_v3 = vrot.slane %v1619_v46, 4 }
  0xf3   : > { %v655_v12 = vrot.slane %v1619_v46, 3  ;;  %v654_v23 = vrot.slane %v1619_v46, 2  ;;  %v653_v37 = vrot.slane %v1619_v46, 1  ;;  %v651_v4 = vrot.slane %v1667_v41, 6 }
  0xf4   : > { %626 = vmatpush.xpose.msra.mxu2 %v619_v48  ;;  %v675_v53 = vperm.slane %v659_v50, 0  ;;  %v674_v60 = vperm.slane %v658_v51, 0  ;;  %v673_v2 = vperm.slane %v657_v61, 0  ;;  %v672_v11 = vperm.slane %v656_v3, 0 }
  0xf5   : > { %v1628_v55 = vpop.f32.mrf.mxu0  ;;  %v671_v19 = vperm.slane %v655_v12, 0  ;;  %v670_v36 = vperm.slane %v654_v23, 0  ;;  %v669_v44 = vperm.slane %v653_v37, 0  ;;  %v612_v51 = vmul.f32 %v580_v32, %v1607_v30 }
  0xf6   : > { %v707_v59 = vmul.f32 %v675_v53, %v1625_v52  ;;  %v706_v1 = vmul.f32 %v674_v60, %v1625_v52  ;;  %v705_v10 = vmul.f32 %v673_v2, %v1625_v52  ;;  %v704_v18 = vmul.f32 %v672_v11, %v1625_v52 }
  0xf7   : > { %v703_v34 = vmul.f32 %v671_v19, %v1625_v52  ;;  %v702_v43 = vmul.f32 %v670_v36, %v1625_v52  ;;  %v579_v53 = vperm.slane %v564_v40, 0  ;;  %v701_v57 = vmul.f32 %v669_v44, %v1625_v52 }
  0xf8   : > { %627 = vmatpush.xpose.msra.mxu2 %v618_v58  ;;  %708 = vmatpush.xpose.msra.mxu3 %v707_v59  ;;  %v668_v58 = vperm.slane %v1619_v46, 0  ;;  %v652_v59 = vrot.slane %v1667_v41, 7  ;;  %v578_v2 = vperm.slane %v563_v54, 0  ;;  %v562_v3 = vrot.slane %v1634_v62, 2 }
  0xf9   : > { %v611_v46 = vmul.f32 %v579_v53, %v1607_v30  ;;  %v666_v17 = vperm.slane %v651_v4, 0  ;;  %v480_v19 = vadd.f32 %v1594_v21, %v1628_v55  ;;  %v649_v55 = vrot.slane %v1667_v41, 4 }
  0xfa   : > { %v577_v16 = vperm.slane %v562_v3, 0  ;;  %v575_v44 = vperm.slane %v1634_v62, 0  ;;  %v646_v3 = vrot.slane %v1667_v41, 1 }
  0xfb   : > { %v698_v36 = vmul.f32 %v666_v17, %v1625_v52 }
  0xfc   : > { %628 = vmatpush.xpose.msra.mxu2 %v617_v0  ;;  %709 = vmatpush.xpose.msra.mxu3 %v706_v1  ;;  %v546_v0 = vadd.f32 %v1599_v22, %v545_v49  ;;  %v609_v33 = vmul.f32 %v577_v16, %v1607_v30  ;;  %v607_v62 = vmul.f32 %v575_v44, %v1607_v30 }
  0xfd   : > { %v482_v5 = vpop.f32.mrf.mxu0 }
  0xfe   : > { %v483_v9 = vadd.f32 %v1594_v21, %v482_v5  ;;  %v700_v5 = vmul.f32 %v668_v58, %v1625_v52  ;;  %v1692_v11 = vmax.f32 %v546_v0, 0.0 }
 0x100   : > { %v1646_v14 = vmax.f32 %v483_v9, 0.0  ;;  %629 = vmatpush.xpose.msra.mxu2 %v616_v6  ;;  %710 = vmatpush.xpose.msra.mxu3 %v705_v10  ;;  %v667_v6 = vperm.slane %v652_v59, 0 }
 0x102   : > { %v745_v20 = vrot.slane %v1646_v14, 7  ;;  %v744_v24 = vrot.slane %v1646_v14, 6  ;;  %v743_v39 = vrot.slane %v1646_v14, 5  ;;  %v742_v48 = vrot.slane %v1646_v14, 4 }
 0x103   : > { %v741_v63 = vrot.slane %v1646_v14, 3  ;;  %v740_v9 = vrot.slane %v1646_v14, 2  ;;  %v754_v49 = vperm.slane %v1646_v14, 0 }
 0x104   : > { %630 = vmatpush.xpose.msra.mxu2 %v615_v15  ;;  %711 = vmatpush.xpose.msra.mxu3 %v704_v18  ;;  %v761_v26 = vperm.slane %v745_v20, 0  ;;  %v760_v38 = vperm.slane %v744_v24, 0  ;;  %v759_v47 = vperm.slane %v743_v39, 0  ;;  %v758_v61 = vperm.slane %v742_v48, 0 }
 0x105   : > { %v1658_v28 = vpop.f32.mrf.mxu0  ;;  %v757_v22 = vperm.slane %v741_v63, 0  ;;  %v610_v15 = vmul.f32 %v578_v2, %v1607_v30  ;;  %v650_v18 = vrot.slane %v1667_v41, 5  ;;  %v699_v20 = vmul.f32 %v667_v6, %v1625_v52 }
 0x106   : > { %v793_v35 = vmul.f32 %v761_v26, %v1654_v25  ;;  %v792_v45 = vmul.f32 %v760_v38, %v1654_v25  ;;  %v791_v60 = vmul.f32 %v759_v47, %v1654_v25  ;;  %v790_v8 = vmul.f32 %v758_v61, %v1654_v25 }
 0x107   : > { %v739_v24 = vrot.slane %v1646_v14, 1  ;;  %v789_v26 = vmul.f32 %v757_v22, %v1654_v25  ;;  %v756_v27 = vperm.slane %v740_v9, 0  ;;  %v665_v37 = vperm.slane %v650_v18, 0 }
 0x108   : > { %631 = vmatpush.xpose.msra.mxu2 %v614_v29  ;;  %712 = vmatpush.xpose.msra.mxu3 %v703_v34  ;;  %v576_v34 = vperm.slane %v561_v13, 0  ;;  %v664_v48 = vperm.slane %v649_v55, 0  ;;  %v786_v61 = vmul.f32 %v754_v49, %v1654_v25 }
 0x109   : > { %794 = vmatpush.xpose.msrb.mxu0 %v793_v35  ;;  %v1706_v35 = vmax.f32 %v480_v19, 0.0  ;;  %v755_v38 = vperm.slane %v739_v24, 0  ;;  %v788_v39 = vmul.f32 %v756_v27, %v1654_v25  ;;  %v697_v47 = vmul.f32 %v665_v37, %v1625_v52 }
 0x10a   : > { %v696_v58 = vmul.f32 %v664_v48, %v1625_v52  ;;  %v660_v19 = vperm.slane %v1667_v41, 0 }
 0x10b   : > { %v736_v6 = vrot.slane %v1706_v35, 5 }
 0x10c   : > { %632 = vmatpush.xpose.msra.mxu2 %v613_v42  ;;  %713 = vmatpush.xpose.msra.mxu3 %v702_v43  ;;  %v608_v43 = vmul.f32 %v576_v34, %v1607_v30  ;;  %v733_v34 = vrot.slane %v1706_v35, 2 }
 0x10d   : > { %795 = vmatpush.xpose.msrb.mxu0 %v792_v45  ;;  %v488_v50 = vpop.f32.mrf.mxu0  ;;  %v648_v45 = vrot.slane %v1667_v41, 3  ;;  %v751_v13 = vperm.slane %v736_v6, 0 }
 0x10e   : > { %v489_v56 = vadd.f32 %v1594_v21, %v488_v50  ;;  %v738_v50 = vrot.slane %v1706_v35, 7 }
 0x10f   : > { %v663_v14 = vperm.slane %v648_v45, 0  ;;  %v783_v24 = vmul.f32 %v751_v13, %v1654_v25  ;;  %v1359_v45 = vmov 0  }
 0x110   : > { %v1682_v1 = vmax.f32 %v489_v56, 0.0  ;;  %633 = vmatpush.xpose.msra.mxu2 %v612_v51  ;;  %714 = vmatpush.xpose.msra.mxu3 %v701_v57  ;;  %v787_v51 = vmul.f32 %v755_v38, %v1654_v25  ;;  %v647_v57 = vrot.slane %v1667_v41, 2  ;;  %v753_v59 = vperm.slane %v738_v50, 0 }
 0x111   : > { %796 = vmatpush.xpose.msrb.mxu0 %v791_v60  ;;  %v737_v60 = vrot.slane %v1706_v35, 6  ;;  %v695_v4 = vmul.f32 %v663_v14, %v1625_v52  ;;  %v692_v41 = vmul.f32 %v660_v19, %v1625_v52  ;;  %v748_v38 = vperm.slane %v733_v34, 0  ;;  %1152 = vset.pattern.permute.xlu0 %v1359_v45 }
 0x112   : > { %v831_v7 = vrot.slane %v1682_v1, 7  ;;  %v830_v10 = vrot.slane %v1682_v1, 6  ;;  %v829_v31 = vrot.slane %v1682_v1, 5  ;;  %v828_v42 = vrot.slane %v1682_v1, 4 }
 0x113   : > { %v827_v56 = vrot.slane %v1682_v1, 3  ;;  %v826_v2 = vrot.slane %v1682_v1, 2  ;;  %v662_v30 = vperm.slane %v647_v57, 0  ;;  %v825_v9 = vrot.slane %v1682_v1, 1 }
 0x114   : > { %634 = vmatpush.xpose.msra.mxu2 %v611_v46  ;;  %715 = vmatpush.xpose.msra.mxu3 %v700_v5  ;;  %v847_v12 = vperm.slane %v831_v7, 0  ;;  %v846_v29 = vperm.slane %v830_v10, 0  ;;  %v845_v40 = vperm.slane %v829_v31, 0  ;;  %v844_v54 = vperm.slane %v828_v42, 0  ;;  %v552_v31 = vld [vmem:[%s1821_s6] sm:$0xff] }
 0x115   : > { %797 = vmatpush.xpose.msrb.mxu0 %v790_v8  ;;  %v843_v0 = vperm.slane %v827_v56, 0  ;;  %v785_v46 = vmul.f32 %v753_v59, %v1654_v25  ;;  %v752_v5 = vperm.slane %v737_v60, 0  ;;  %v486_v7 = vadd.f32 %v1594_v21, %v1658_v28 }
 0x116   : > { %v879_v23 = vmul.f32 %v847_v12, %v1692_v11  ;;  %v878_v32 = vmul.f32 %v846_v29, %v1692_v11  ;;  %v877_v53 = vmul.f32 %v845_v40, %v1692_v11  ;;  %v876_v63 = vmul.f32 %v844_v54, %v1692_v11 }
 0x117   : > { %v875_v8 = vmul.f32 %v843_v0, %v1692_v11  ;;  %v842_v22 = vperm.slane %v826_v2, 0  ;;  %v694_v10 = vmul.f32 %v662_v30, %v1625_v52  ;;  %v661_v12 = vperm.slane %v646_v3, 0 }
 0x118   : > { %635 = vmatpush.xpose.msra.mxu2 %v610_v15  ;;  %716 = vmatpush.xpose.msra.mxu3 %v699_v20  ;;  %v735_v15 = vrot.slane %v1706_v35, 4  ;;  %v1738_v16 = vmax.f32 %v486_v7, 0.0  ;;  %v784_v17 = vmul.f32 %v752_v5, %v1654_v25  ;;  %v841_v28 = vperm.slane %v825_v9, 0 }
 0x119   : > { %798 = vmatpush.xpose.msrb.mxu0 %v789_v26  ;;  %880 = vmatpush.xpose.msrb.mxu1 %v879_v23  ;;  %v874_v21 = vmul.f32 %v842_v22, %v1692_v11  ;;  %v693_v18 = vmul.f32 %v661_v12, %v1625_v52  ;;  %v734_v23 = vrot.slane %v1706_v35, 3  ;;  %v840_v27 = vperm.slane %v1682_v1, 0 }
 0x11a   : > { %v750_v20 = vperm.slane %v735_v15, 0  ;;  %v873_v26 = vmul.f32 %v841_v28, %v1692_v11  ;;  %v824_v29 = vrot.slane %v1738_v16, 7  ;;  %v823_v37 = vrot.slane %v1738_v16, 6 }
 0x11b   : > { %v822_v42 = vrot.slane %v1738_v16, 5  ;;  %v821_v50 = vrot.slane %v1738_v16, 4  ;;  %v819_v59 = vrot.slane %v1738_v16, 2  ;;  %v832_v2 = vperm.slane %v1738_v16, 0 }
 0x11c   : > { %636 = vmatpush.xpose.msra.mxu2 %v609_v33  ;;  %717 = vmatpush.xpose.msra.mxu3 %v698_v36  ;;  %v749_v33 = vperm.slane %v734_v23, 0  ;;  %v782_v55 = vmul.f32 %v750_v20, %v1654_v25  ;;  %v872_v36 = vmul.f32 %v840_v27, %v1692_v11  ;;  %v839_v1 = vperm.slane %v824_v29, 0 }
 0x11d   : > { %799 = vmatpush.xpose.msrb.mxu0 %v788_v39  ;;  %881 = vmatpush.xpose.msrb.mxu1 %v878_v32  ;;  %v732_v39 = vrot.slane %v1706_v35, 1  ;;  %v838_v40 = vperm.slane %v823_v37, 0  ;;  %v837_v49 = vperm.slane %v822_v42, 0  ;;  %v836_v56 = vperm.slane %v821_v50, 0 }
 0x11e   : > { %v781_v32 = vmul.f32 %v749_v33, %v1654_v25  ;;  %v871_v52 = vmul.f32 %v839_v1, %v1692_v11  ;;  %v834_v60 = vperm.slane %v819_v59, 0  ;;  %v864_v30 = vmul.f32 %v832_v2, %v1692_v11 }
 0x11f   : > { %v747_v44 = vperm.slane %v732_v39, 0  ;;  %v870_v48 = vmul.f32 %v838_v40, %v1692_v11  ;;  %v869_v54 = vmul.f32 %v837_v49, %v1692_v11 }
 0x120   : > { %637 = vmatpush.xpose.msra.mxu2 %v608_v43  ;;  %718 = vmatpush.xpose.msra.mxu3 %v697_v47  ;;  %v553_v43 = vld [vmem:[%s1822_s7] sm:$0xff]  ;;  %v780_v47 = vmul.f32 %v748_v38, %v1654_v25 }
 0x121   : > { %800 = vmatpush.xpose.msrb.mxu0 %v787_v51  ;;  %882 = vmatpush.xpose.msrb.mxu1 %v877_v53  ;;  %v746_v51 = vperm.slane %v1706_v35, 0  ;;  %v779_v53 = vmul.f32 %v747_v44, %v1654_v25 }
 0x122   : > { %556 = vperm.xlu0 %1152, %v553_v43  }
 0x123   : > { %v778_v57 = vmul.f32 %v746_v51, %v1654_v25 }
 0x124   : > { %638 = vmatpush.xpose.msra.mxu2 %v607_v62  ;;  %719 = vmatpush.xpose.msra.mxu3 %v696_v58  ;;  %v820_v62 = vrot.slane %v1738_v16, 3  ;;  %v868_v58 = vmul.f32 %v836_v56, %v1692_v11 }
 0x125   : > { %801 = vmatpush.xpose.msrb.mxu0 %v786_v61  ;;  %883 = vmatpush.xpose.msrb.mxu1 %v876_v63  ;;  %v818_v61 = vrot.slane %v1738_v16, 1  ;;  %v866_v63 = vmul.f32 %v834_v60, %v1692_v11 }
 0x126   : > { %v835_v14 = vperm.slane %v820_v62, 0 }
 0x127   : > { %639 = vmatmul.f32.vlgmr.msra.gmra.mxu2 %v552_v31  ;;  %v833_v0 = vperm.slane %v818_v61, 0 }
 0x128   : > { %720 = vmatpush.xpose.msra.mxu3 %v695_v4  ;;  %v867_v35 = vmul.f32 %v835_v14, %v1692_v11 }
 0x129   : > { %802 = vmatpush.xpose.msrb.mxu0 %v785_v46  ;;  %884 = vmatpush.xpose.msrb.mxu1 %v875_v8  ;;  %v865_v25 = vmul.f32 %v833_v0, %v1692_v11 }
 0x12c   : > { %721 = vmatpush.xpose.msra.mxu3 %v694_v10 }
 0x12d   : > { %803 = vmatpush.xpose.msrb.mxu0 %v784_v17  ;;  %885 = vmatpush.xpose.msrb.mxu1 %v874_v21 }
 0x130   : > { %722 = vmatpush.xpose.msra.mxu3 %v693_v18 }
 0x131   : > { %804 = vmatpush.xpose.msrb.mxu0 %v783_v24  ;;  %886 = vmatpush.xpose.msrb.mxu1 %v873_v26 }
 0x134   : > { %723 = vmatpush.xpose.msra.mxu3 %v692_v41 }
 0x135   : > { %805 = vmatpush.xpose.msrb.mxu0 %v782_v55  ;;  %887 = vmatpush.xpose.msrb.mxu1 %v872_v36 }
 0x137   : > { %724 = vmatmul.f32.vlgmr.msra.gmra.mxu3 %v552_v31 }
 0x139   : > { %806 = vmatpush.xpose.msrb.mxu0 %v781_v32  ;;  %888 = vmatpush.xpose.msrb.mxu1 %v871_v52 }
 0x13d   : > { %807 = vmatpush.xpose.msrb.mxu0 %v780_v47  ;;  %889 = vmatpush.xpose.msrb.mxu1 %v870_v48 }
 0x141   : > { %808 = vmatpush.xpose.msrb.mxu0 %v779_v53  ;;  %890 = vmatpush.xpose.msrb.mxu1 %v869_v54 }
 0x145   : > { %809 = vmatpush.xpose.msrb.mxu0 %v778_v57  ;;  %891 = vmatpush.xpose.msrb.mxu1 %v868_v58 }
 0x148   : > { %810 = vmatmul.f32.vlgmr.msrb.gmra.mxu0 %v552_v31 }
 0x149   : > { %892 = vmatpush.xpose.msrb.mxu1 %v867_v35 }
 0x14d   : > { %893 = vmatpush.xpose.msrb.mxu1 %v866_v63 }
 0x151   : > { %894 = vmatpush.xpose.msrb.mxu1 %v865_v25 }
 0x155   : > { %895 = vmatpush.xpose.msrb.mxu1 %v864_v30 }
 0x158   : > { %896 = vmatmul.f32.vlgmr.msrb.gmra.mxu1 %v552_v31 }
 0x194   : > { %v557_v3 = vpop.permute.xlu0 %556 }
 0x1aa   : > { %v640_v4 = vpop.f32.mrf.mxu2 }
 0x1ab   : > { %v641_v46 = vadd.f32 %v640_v4, %v557_v3 }
 0x1ad   : > { %643 = vst [vmem:[%s401_s22] sm:$0xff] %v641_v46 }
 0x1ba   : > { %v725_v5 = vpop.f32.mrf.mxu3 }
 0x1bb   : > { %v726_v6 = vadd.f32 %v725_v5, %v557_v3 }
 0x1bd   : > { %1063 = vst [vmem:[%s401_s22 + $0x8] sm:$0xff] %v726_v6 }
 0x1c5   : > { %v811_v7 = vpop.f32.mrf.mxu0 }
 0x1c6   : > { %v812_v8 = vadd.f32 %v811_v7, %v557_v3 }
 0x1c8   : > { %1064 = vst [vmem:[%s401_s22 + $0x10] sm:$0xff] %v812_v8 }
 0x1d5   : > { %v897_v11 = vpop.f32.mrf.mxu1 }
 0x1d6   : > { %v898_v22 = vadd.f32 %v897_v11, %v557_v3 }
 0x1d8   : > { %1065 = vst [vmem:[%s401_s22 + $0x18] sm:$0xff] %v898_v22 }
 0x1d9   : > { %1302 = shalt.err (!%p1299_p9)
}
 0x1da   : > { %s1360_s2 = smov 128   ;;  %s1361_s15 = smov 8  }
 0x1db   : > { %1087 = dma.vmem_to_hbm [thread:$0]  (%p1479_p3), %s916_s23, 512, %s918_s18, %s903_s16, %s1360_s2, %s1360_s2, %s1361_s15  }
 0x1dc PF: > { %s1849_s29 = sld [smem:[#allocation16_spill]]  ;;  %p1851_p12 = scmp.ge.s32.totalorder %s1353_s30, 2 }
 0x1de   : > { %p1104_p13 = pnand %p1851_p12, %p1442_p6 }
 0x1e0   : > { %p1105_p0 = pneg %p1104_p13 }
 0x1e2   : > { %s932_s24 = sand.u32 1, %s1849_s29  }
 0x1e3   : > { %s933_s4 = scalar_lea.sflag [#allocation4], %s932_s24 }
 0x1e4   : > { %1336 = dma.done.wait (%p1105_p0), %s933_s4, 512  }
 0x1e5   : > { %1338 = vsyncadd (%p1105_p0), %s933_s4, 4294966784  ;;  %s1852_s30 = sld [smem:[#allocation19_spill]]  ;;  %s1855_s27 = smov %s1345_s28 }
 0x1e6   : > { %s1853_s22 = sld [smem:[#allocation17_spill]] }
 0x1e7   : > { %s1854_s29 = sld [smem:[#allocation20_spill]] }
 0x1eb   : > { %p25_p5 = scmp.ge.s32.totalorder %s1852_s30, 4  }
 0x1ec   : > { %s1856_s28 = smov %s1853_s22 }
 0x1ed   :  { %27 = sbr.rel (!%p25_p5) target bundleno = 11 (0xb), region = 121 }
 0x1f2   :  { %939 = vsyncpa [#allocation3], 1 }
 0x1f3   :  { %941 = vsyncpa [#allocation3 + $0x1], 1 }
 0x1f4   :  { %942 = vsyncpa [#allocation6], 1 }
 0x1f5   :  { %944 = vsyncpa [#allocation6 + $0x1], 1 }
 0x1f6   :  { %945 = vsyncpa [#allocation9], 1 }
 0x1f7   :  { %946 = vsyncpa [#allocation4], 1 }
 0x1f8   :  { %948 = vsyncpa [#allocation4 + $0x1], 1 }

</bundles_post_ra>
